<compile_context>
chip_gen: v7x
topology: tpu7x:2x2x1
jax: 0.10.0
libtpu: 0.0.40
codegen_flags: <defaults>
</compile_context>

<pallas_src>
import functools

import numpy as np
import jax
import jax.numpy as jnp
from jax.experimental import pallas as pl
from jax.experimental.pallas import tpu as pltpu


def _round_up(v, m):
    return (v + m - 1) // m * m


def _vs_loss_kernel(x_ref, inv_delta_ref, iota_ref, tgt_ref, out_ref, *,
                    n_true, chunk_c):
    """One row tile: sum over valid rows of -log softmax(x/Delta + iota)[tgt]."""
    t, c = x_ref.shape
    tgt = tgt_ref[...]                                       # (T, 1) int32

    # Online-softmax accumulators; the full (T, C) f32 z is never materialized.
    m = jnp.full((t, 1), -jnp.inf, dtype=jnp.float32)        # running max
    l = jnp.zeros((t, 1), dtype=jnp.float32)                 # running sum-exp
    zt = jnp.zeros((t, 1), dtype=jnp.float32)                # target logit

    # Column iota hoisted out of the chunk loop (compare against tgt - c0).
    col = jax.lax.broadcasted_iota(jnp.int32, (t, min(c, chunk_c)), 1)

    for c0 in range(0, c, chunk_c):                          # static unroll
        w = min(chunk_c, c - c0)
        # Recompute z for this chunk on the fly: one mul + add per element.
        z = (x_ref[:, c0:c0 + w].astype(jnp.float32)
             * inv_delta_ref[:, c0:c0 + w]
             + iota_ref[:, c0:c0 + w])                       # (T, w) f32
        m_new = jnp.maximum(m, jnp.max(z, axis=-1, keepdims=True))
        alpha = jnp.exp(m - m_new)
        l = alpha * l + jnp.sum(jnp.exp(z - m_new), axis=-1, keepdims=True)
        # Fused one-hot target-logit extraction (reuses this chunk's z).
        col_w = col[:, :w]
        zt = zt + jnp.sum(jnp.where(col_w == (tgt - c0), z, 0.0),
                          axis=-1, keepdims=True)
        m = m_new

    # -log p[target] = m + log(sum exp(z - m)) - z[target]
    per_sample = (m + jnp.log(l)) - zt                       # (T, 1)

    # Mask rows of the ragged last tile (x is NOT padded on the host; the
    # select keeps NaN/Inf from any garbage rows out of the partial sum).
    row = jax.lax.broadcasted_iota(jnp.int32, per_sample.shape, 0)
    valid = (pl.program_id(0) * t + row) < n_true
    per_sample = jnp.where(valid, per_sample, 0.0)

    # Lane-dense per-tile partial sum -> grid axis stays fully parallel.
    out_ref[...] = jnp.full(out_ref.shape, jnp.sum(per_sample), jnp.float32)


def _default_vmem_budget_bytes():
    """~75% of this chip's VMEM, capped so the sizing also fits v7x (64 MiB)."""
    try:
        cap = int(pltpu.get_tpu_info().vmem_capacity_bytes)
    except Exception:
        cap = 64 * 1024 * 1024
    return int(max(16 * 1024 * 1024, min(cap * 3 // 4, 96 * 1024 * 1024)))


def vs_loss(x, target, delta_list, iota_list, *, tile_n=None, chunk_c=512,
            vmem_budget_bytes=None):
    """VSLoss forward: mean cross-entropy of (x / Delta + iota, target).

    x: (N, C) logits, any float dtype (cast to f32 inside the kernel; feeding
       bf16 halves the dominant HBM stream on v5e/v6e).
    target: (N,) int class ids in [0, C).
    delta_list / iota_list: (C,) parameters from make_vs_params.
    """
    n, c = x.shape
    itemsize = jnp.dtype(x.dtype).itemsize

    # Class-chunk width for the in-kernel online softmax (lane multiple; keep
    # the statically-unrolled chunk count bounded for very large C).
    chunk_c = max(128, _round_up(min(chunk_c, c), 128))
    max_chunks = 32
    if pl.cdiv(c, chunk_c) > max_chunks:
        chunk_c = _round_up(pl.cdiv(c, max_chunks), 128)

    if vmem_budget_bytes is None:
        vmem_budget_bytes = _default_vmem_budget_bytes()

    if tile_n is None:
        # Per-row VMEM: double-buffered x block + f32 chunk temporaries
        # (z, exp, select) + lane-padded (T, 1) accumulators.
        bytes_per_row = (2 * c * itemsize
                         + 3 * min(c, chunk_c) * 4
                         + 4096)
        fixed = 4 * c * 4 + 4 * 8 * 128 * 4          # params + out buffers
        usable = int(vmem_budget_bytes * 0.8) - fixed
        tile_n = max(8, min(2048, usable // bytes_per_row))
    # Never bigger than the (row-rounded) batch; keep >= 2 row tiles so the
    # parallel grid axis can split across v7x's two TensorCores.
    tile_n = min(int(tile_n), _round_up(n, 8), _round_up(pl.cdiv(n, 2), 8))
    tile_n = max(8, (tile_n // 8) * 8)

    num_tiles = pl.cdiv(n, tile_n)

    # Host-side parameter prep: multiply by 1/Delta in the kernel.
    inv_delta = (1.0 / delta_list.astype(jnp.float32)).reshape(1, c)
    iota = iota_list.astype(jnp.float32).reshape(1, c)
    tgt = target.reshape(n, 1).astype(jnp.int32)

    kernel = functools.partial(_vs_loss_kernel, n_true=n, chunk_c=chunk_c)
    cost = pl.CostEstimate(
        flops=8 * n * c,
        transcendentals=n * c,
        bytes_accessed=(n * c * itemsize + n * 4 + 2 * c * 4
                        + num_tiles * 8 * 128 * 4),
    )

    partial_sums = pl.pallas_call(
        kernel,
        out_shape=jax.ShapeDtypeStruct((num_tiles, 8, 128), jnp.float32),
        grid=(num_tiles,),
        in_specs=[
            pl.BlockSpec((tile_n, c), lambda i: (i, 0)),   # x row tile (native dtype)
            pl.BlockSpec((1, c), lambda i: (0, 0)),        # 1 / Delta
            pl.BlockSpec((1, c), lambda i: (0, 0)),        # iota
            pl.BlockSpec((tile_n, 1), lambda i: (i, 0)),   # target ids
        ],
        out_specs=pl.BlockSpec((1, 8, 128), lambda i: (i, 0, 0)),
        compiler_params=pltpu.CompilerParams(
            dimension_semantics=("parallel",),
            vmem_limit_bytes=int(vmem_budget_bytes),
        ),
        cost_estimate=cost,
    )(x, inv_delta, iota, tgt)

    # Tiny final reduction over num_tiles scalars; divide by the true N.
    return jnp.sum(partial_sums[:, 0, 0]) / jnp.float32(n)


def make_vs_params(cls_num_list, gamma=0.3, tau=1.0):
    """Deterministic parameter setup mirroring VSLoss.__init__."""
    cls_num_list = np.asarray(cls_num_list, dtype=np.float64)
    cls_probs = cls_num_list / cls_num_list.sum()
    temp = (1.0 / cls_num_list) ** gamma
    temp = temp / temp.min()
    iota_list = tau * np.log(cls_probs)
    delta_list = temp
    return (jnp.asarray(delta_list, dtype=jnp.float32),
            jnp.asarray(iota_list, dtype=jnp.float32))


def vs_loss_ref(x, target, delta_list, iota_list):
    z = x.astype(jnp.float32) / delta_list[None, :] + iota_list[None, :]
    logp = jax.nn.log_softmax(z, axis=-1)
    picked = jnp.take_along_axis(
        logp, target[:, None].astype(jnp.int32), axis=-1)[:, 0]
    return -jnp.mean(picked)


if __name__ == "__main__":
    key = jax.random.PRNGKey(0)

    # Test 1: 20 samples, 16 classes. tile_n=8 forces a multi-tile grid with a
    # ragged last row tile (no host padding) and a single sub-128 class chunk.
    N1, C1 = 20, 16
    d1, i1 = make_vs_params([int(1000 / (i + 1)) for i in range(C1)])
    k1, k2, k3, k4 = jax.random.split(key, 4)
    x1 = jax.random.normal(k1, (N1, C1), dtype=jnp.float32)
    t1 = jax.random.randint(k2, (N1,), 0, C1, dtype=jnp.int32)
    out1 = jax.block_until_ready(vs_loss(x1, t1, d1, i1, tile_n=8))
    ref1 = jax.block_until_ready(vs_loss_ref(x1, t1, d1, i1))
    assert jnp.allclose(out1, ref1, rtol=1e-5, atol=1e-4), (out1, ref1)

    # Test 2: 24 samples, 300 classes with chunk_c=128 -> exercises the
    # multi-chunk online-softmax path (two full chunks + a 44-lane tail) and
    # the auto tile_n heuristic (capped to give 2 row tiles).
    N2, C2 = 24, 300
    d2, i2 = make_vs_params([int(5000 / (i + 1)) for i in range(C2)])
    x2 = jax.random.normal(k3, (N2, C2), dtype=jnp.float32)
    t2 = jax.random.randint(k4, (N2,), 0, C2, dtype=jnp.int32)
    out2 = jax.block_until_ready(vs_loss(x2, t2, d2, i2, chunk_c=128))
    ref2 = jax.block_until_ready(vs_loss_ref(x2, t2, d2, i2))
    assert jnp.allclose(out2, ref2, rtol=1e-5, atol=1e-4), (out2, ref2)

    print("KERNEL_OK")
</pallas_src>

<mosaic_0001>
module attributes {stable_mosaic.version = 11 : i64} {
  func.func @_vs_loss_kernel(%arg0: i32, %arg1: memref<8x16xf32, #tpu.memory_space<vmem>>, %arg2: memref<1x16xf32, #tpu.memory_space<vmem>>, %arg3: memref<1x16xf32, #tpu.memory_space<vmem>>, %arg4: memref<8x1xi32, #tpu.memory_space<vmem>>, %arg5: memref<1x8x128xf32, #tpu.memory_space<vmem>>) attributes {dimension_semantics = [#tpu.dimension_semantics<parallel>], iteration_bounds = array<i64: 3>, scalar_prefetch = 0 : i64, scratch_operands = 0 : i64, tpu.core_type = #tpu.core_type<tc>, window_params = [{transform_indices = @transform_0, window_bounds = array<i64: 8, 16>}, {pipeline_mode = #tpu.pipeline_mode<synchronous>, transform_indices = @transform_1, window_bounds = array<i64: 1, 16>}, {pipeline_mode = #tpu.pipeline_mode<synchronous>, transform_indices = @transform_2, window_bounds = array<i64: 1, 16>}, {transform_indices = @transform_3, window_bounds = array<i64: 8, 1>}, {transform_indices = @transform_4, window_bounds = array<i64: 1, 8, 128>}]} {
    %c0 = arith.constant 0 : index
    %c0_0 = arith.constant 0 : index
    %0 = vector.load %arg4[%c0, %c0_0] : memref<8x1xi32, #tpu.memory_space<vmem>>, vector<8x1xi32>
    %cst = arith.constant 0xFF800000 : f32
    %1 = vector.broadcast %cst : f32 to vector<8x1xf32>
    %cst_1 = arith.constant 0.000000e+00 : f32
    %2 = vector.broadcast %cst_1 : f32 to vector<8x1xf32>
    %cst_2 = arith.constant 0.000000e+00 : f32
    %3 = vector.broadcast %cst_2 : f32 to vector<8x1xf32>
    %4 = tpu.iota {dimensions = array<i32: 1>} : vector<8x16xi32>
    %c0_3 = arith.constant 0 : index
    %c0_4 = arith.constant 0 : index
    %5 = vector.load %arg1[%c0_3, %c0_4] : memref<8x16xf32, #tpu.memory_space<vmem>>, vector<8x16xf32>
    %c0_5 = arith.constant 0 : index
    %c0_6 = arith.constant 0 : index
    %6 = vector.load %arg2[%c0_5, %c0_6] : memref<1x16xf32, #tpu.memory_space<vmem>>, vector<1x16xf32>
    %7 = vector.broadcast %6 : vector<1x16xf32> to vector<8x16xf32>
    %8 = arith.mulf %5, %7 : vector<8x16xf32>
    %c0_7 = arith.constant 0 : index
    %c0_8 = arith.constant 0 : index
    %9 = vector.load %arg3[%c0_7, %c0_8] : memref<1x16xf32, #tpu.memory_space<vmem>>, vector<1x16xf32>
    %10 = vector.broadcast %9 : vector<1x16xf32> to vector<8x16xf32>
    %11 = arith.addf %8, %10 : vector<8x16xf32>
    %cst_9 = arith.constant dense<0xFF800000> : vector<8xf32>
    %12 = vector.multi_reduction <maximumf>, %11, %cst_9 [1] : vector<8x16xf32> to vector<8xf32>
    %13 = vector.shape_cast %12 : vector<8xf32> to vector<8x1xf32>
    %14 = arith.maximumf %1, %13 : vector<8x1xf32>
    %15 = arith.subf %1, %14 : vector<8x1xf32>
    %16 = math.exp %15 : vector<8x1xf32>
    %17 = arith.mulf %16, %2 : vector<8x1xf32>
    %18 = vector.broadcast %14 : vector<8x1xf32> to vector<8x16xf32>
    %19 = arith.subf %11, %18 : vector<8x16xf32>
    %20 = math.exp %19 : vector<8x16xf32>
    %cst_10 = arith.constant dense<0.000000e+00> : vector<8xf32>
    %21 = vector.multi_reduction <add>, %20, %cst_10 [1] : vector<8x16xf32> to vector<8xf32>
    %22 = vector.shape_cast %21 : vector<8xf32> to vector<8x1xf32>
    %23 = arith.addf %17, %22 : vector<8x1xf32>
    %c0_i32 = arith.constant 0 : i32
    %24 = vector.broadcast %c0_i32 : i32 to vector<8x1xi32>
    %25 = arith.subi %0, %24 : vector<8x1xi32>
    %26 = vector.broadcast %25 : vector<8x1xi32> to vector<8x16xi32>
    %27 = arith.cmpi eq, %4, %26 : vector<8x16xi32>
    %cst_11 = arith.constant 0.000000e+00 : f32
    %28 = vector.broadcast %cst_11 : f32 to vector<8x16xf32>
    %29 = arith.select %27, %11, %28 : vector<8x16xi1>, vector<8x16xf32>
    %cst_12 = arith.constant dense<0.000000e+00> : vector<8xf32>
    %30 = vector.multi_reduction <add>, %29, %cst_12 [1] : vector<8x16xf32> to vector<8xf32>
    %31 = vector.shape_cast %30 : vector<8xf32> to vector<8x1xf32>
    %32 = arith.addf %3, %31 : vector<8x1xf32>
    %33 = math.log %23 : vector<8x1xf32>
    %34 = arith.addf %14, %33 : vector<8x1xf32>
    %35 = arith.subf %34, %32 : vector<8x1xf32>
    %36 = tpu.iota {dimensions = array<i32: 0>} : vector<8x1xi32>
    %c8_i32 = arith.constant 8 : i32
    %37 = arith.muli %arg0, %c8_i32 : i32
    %38 = vector.broadcast %37 : i32 to vector<8x1xi32>
    %39 = arith.addi %38, %36 : vector<8x1xi32>
    %c20_i32 = arith.constant 20 : i32
    %40 = vector.broadcast %c20_i32 : i32 to vector<8x1xi32>
    %41 = arith.cmpi slt, %39, %40 : vector<8x1xi32>
    %cst_13 = arith.constant 0.000000e+00 : f32
    %42 = vector.broadcast %cst_13 : f32 to vector<8x1xf32>
    %43 = arith.select %41, %35, %42 : vector<8x1xi1>, vector<8x1xf32>
    %44 = vector.shape_cast %43 : vector<8x1xf32> to vector<1x8x1xf32>
    %cst_14 = arith.constant dense<0.000000e+00> : vector<1xf32>
    %45 = vector.multi_reduction <add>, %44, %cst_14 [1, 2] : vector<1x8x1xf32> to vector<1xf32>
    %46 = vector.shape_cast %45 : vector<1xf32> to vector<1x1x1xf32>
    %47 = vector.extract %46[0, 0, 0] : f32 from vector<1x1x1xf32>
    %48 = vector.broadcast %47 : f32 to vector<1x8x128xf32>
    %c0_15 = arith.constant 0 : index
    %c0_16 = arith.constant 0 : index
    %c0_17 = arith.constant 0 : index
    %49 = vector.load %arg5[%c0_15, %c0_16, %c0_17] : memref<1x8x128xf32, #tpu.memory_space<vmem>>, vector<1x8x128xf32>
    tpu.vector_store %arg5[%c0_15, %c0_16, %c0_17], %48 {strides = array<i32>} : memref<1x8x128xf32, #tpu.memory_space<vmem>>, vector<1x8x128xf32>,
    return
  }
  func.func @transform_0(%arg0: i32) -> (i32, i32) {
    %c0_i32 = arith.constant 0 : i32
    %c0_i32_0 = arith.constant 0 : i32
    return %arg0, %c0_i32 : i32, i32
  }
  func.func @transform_1(%arg0: i32) -> (i32, i32) {
    %c0_i32 = arith.constant 0 : i32
    %c0_i32_0 = arith.constant 0 : i32
    %c0_i32_1 = arith.constant 0 : i32
    return %c0_i32, %c0_i32_0 : i32, i32
  }
  func.func @transform_2(%arg0: i32) -> (i32, i32) {
    %c0_i32 = arith.constant 0 : i32
    %c0_i32_0 = arith.constant 0 : i32
    %c0_i32_1 = arith.constant 0 : i32
    return %c0_i32, %c0_i32_0 : i32, i32
  }
  func.func @transform_3(%arg0: i32) -> (i32, i32) {
    %c0_i32 = arith.constant 0 : i32
    %c0_i32_0 = arith.constant 0 : i32
    return %arg0, %c0_i32 : i32, i32
  }
  func.func @transform_4(%arg0: i32) -> (i32, i32, i32) {
    %c0_i32 = arith.constant 0 : i32
    %c0_i32_0 = arith.constant 0 : i32
    %c0_i32_1 = arith.constant 0 : i32
    return %arg0, %c0_i32, %c0_i32_0 : i32, i32, i32
  }
}

</mosaic_0001>

<bundles_post_ra>
// kernel: tpu_custom_call.1
= control target key start
LH: loop header
LB: loop body
LE: loop exit
PB: predicated region body
PF: predicated region fallthrough
CT: control target
= control target key end

     0   :  { %9 = vsyncpa [#allocation3], 0  ;;  %s630_s0 = inlined_call_operand.vmem [shape: f32[20,16], index: 0, kind: input, shape index: {}]   ;;  %s631_s1 = inlined_call_operand.vmem [shape: f32[1,16], index: 1, kind: input, shape index: {}]   ;;  %s632_s2 = inlined_call_operand.vmem [shape: f32[1,16], index: 2, kind: input, shape index: {}]   ;;  %s633_s3 = inlined_call_operand.vmem [shape: s32[20,1], index: 3, kind: input, shape index: {}]   ;;  %s634_s4 = inlined_call_operand.hbm [shape: f32[3,8,128], index: 4, kind: output, shape index: {}]  }
   0x1   :  { %11 = vsyncpa [#allocation3 + $0x1], 0  ;;  %s517_s15 = smov 0   ;;  %s519_s16 = smov 0  }
   0x2   :  { %s521_s17 = smov 0   ;;  %s523_s18 = smov 0  }
   0x3 LB: > { %s538_s19 = sadd.s32 4294967295, %s488_s18   ;;  %s363_s20 = sadd.s32 4294967294, %s488_s18   ;;  %s488_s18 = sphi %s523_s18, %s640_s18   ;;  %s484_s17 = sphi %s521_s17, %s639_s17   ;;  %s480_s16 = sphi %s519_s16, %s638_s16   ;;  %s476_s15 = sphi %s517_s15, %s637_s15  }
   0x4   : > { %s542_s21 = sadd.s32 1, %s488_s18   ;;  %s118_s22 = sadd.s32 1, %s484_s17 }
   0x5   : > { %s115_s23 = ssub.s32 %s488_s18, %s542_s21  ;;  %p128_p0 = scmp.ne.s32.totalorder %s484_s17, %s480_s16 }
   0x6   : > { %p116_p1 = scmp.eq.s32.totalorder %s115_s23, 0  ;;  %p129_p2 = scmp.eq.s32.totalorder %s538_s19, 2 }
   0x7   : > { %p134_p3 = scmp.ne.s32.totalorder %s480_s16, %s476_s15  ;;  %p135_p4 = scmp.eq.s32.totalorder %s363_s20, 2 }
   0x8   : > { %s553_s24 = scalar_select %p116_p1, %s484_s17, %s118_s22  }
   0x9   : > { %p555_p5 = por %p129_p2, %p128_p0  ;;  %p559_p6 = por %p135_p4, %p134_p3 }
   0xa   : > { %p366_p7 = scmp.ge.s32.totalorder %s488_s18, 1  ;;  %p173_p8 = scmp.lt.s32.totalorder %s488_s18, 4 }
   0xc   : > { %p174_p9 = pnand %p366_p7, %p173_p8 }
   0xd   : > { %p202_p10 = scmp.lt.s32.totalorder (!%p174_p9), %s538_s19, 2  ;;  %v490_v0 = vmov (!%p174_p9), 0   ;;  %v370_v1 = vld [vmem:[%s631_s1] ss:$0 sm:$0xff] (!%p174_p9)  ;;  %vm230_vm0 = vcmask (!%p174_p9), 130048   ;;  %v211_v11 = vlaneseq (!%p174_p9)  ;;  %s372_s13 = sshll.u32 (!%p174_p9), %s538_s19, 3 }
   0xe   : > { %177 = sbr.rel (%p174_p9) target bundleno = 571 (0x23b), region = 36  ;;  %419 = vset.pattern.permute.xlu0 (!%p174_p9), %v490_v0  ;;  %v371_v3 = vld [vmem:[%s632_s2] ss:$0 sm:$0xff] (!%p174_p9)  ;;  %v261_v25 = vstv (!%p174_p9), %s372_s13  ;;  %vm265_vm3 = vcmask (!%p174_p9), 7168   ;;  %s199_s14 = sand.u32 (!%p174_p9), 1, %s480_s16  }
   0xf   : > { %v212_v12 = vand.u32 (!%p174_p9), 127, %v211_v11  ;;  %v259_v24 = vshrl.u32 (!%p174_p9), %v211_v11, 7  ;;  %s367_s20 = sshll.u32 (!%p174_p9), %s199_s14, 3  ;;  %s279_s6 = scalar_lea.sflag (!%p174_p9), [#allocation3], %s199_s14 }
  0x10   : > { %s201_s22 = scalar_lea.vmem (!%p174_p9), [#allocation2], %s367_s20 }
  0x11   : > { %v262_v27 = vadd.s32 (!%p174_p9), %v261_v25, %v259_v24  ;;  %s292_s23 = sshll.u32 (!%p174_p9), %s201_s22, 4  ;;  %s585_s23 = int_to_ptr.vmem [resolvable:$true] %s292_s23 }
  0x13   : > { %vm263_vm2 = vcmp.lt.s32.totalorder (!%p174_p9), %v262_v27, 20 }
  0x15   : > { %s203_s27 = scalar_select %p202_p10, %s538_s19, 2 }
  0x17   : > { %s368_s28 = sshll.u32 %s203_s27, 3  ;;  %s374_s27 = sshll.u32 %s538_s19, 7 }
  0x18   : > { %s205_s7 = scalar_lea.vmem %s630_s0, %s368_s28  ;;  %s209_s12 = scalar_lea.vmem %s633_s3, %s368_s28 }
  0x19   : > { %v213_v2 = vld [vmem:[%s205_s7] sm:$0xff]  ;;  %s590_s5 = scalar_lea.hbm %s634_s4, %s374_s27  ;;  %s426_s7 = scalar_lea.vmem %s585_s23, 128 }
  0x1a   : > { %v221_v4 = vmul.f32 %v370_v1, %v213_v2  ;;  %v210_v7 = vld [vmem:[%s209_s12] sm:$0xff]  ;;  %p427_p11 = scmp.ne.s32.totalorder %s585_s23, %s426_s7  ;;  %s491_s19 = smov [#allocation2]  }
  0x1b   : > { %s430_s8 = sshll.u32 %s491_s19, 4  ;;  %s431_s8 = int_to_ptr.vmem [resolvable:$false] %s430_s8 }
  0x1c   : > { %v229_v5 = vadd.f32 %v371_v3, %v221_v4  ;;  %p428_p12 = pnand %p427_p11, %p555_p5  ;;  %s432_s9 = scalar_lea.vmem %s431_s8, 256 }
  0x1d   : > { %p433_p0 = scmp.lt.s32.totalorder %s585_s23, %s431_s8  ;;  %p434_p1 = scmp.lt.s32.totalorder %s432_s9, %s426_s7 }
  0x1e   : > { %v231_v6 = vsel %vm230_vm0, %v229_v5, -inf  ;;  %p429_p13 = pneg %p428_p12 }
  0x1f   : > { %232 = vmax.xlane.f32.xlu0 %v231_v6  ;;  %p435_p2 = por %p434_p1, %p433_p0 }
  0x21   : > { %p436_p3 = pnand %p435_p2, %p429_p13 }
  0x35   : > { %246 = vperm.xlu0 %419, %v210_v7  }
  0xac   : > { %v233_v8 = vpop.xlane.xlu0 %232 }
  0xad   : > { %v238_v9 = vsub.f32 %v229_v5, %v233_v8  ;;  %v234_v18 = vsub.f32 -inf, %v233_v8 }
  0xaf   : > { %v239_v10 = vmul.f32 1.442695, %v238_v9  ;;  %v235_v19 = vmul.f32 1.442695, %v234_v18 }
  0xb1   : > { %420 = vpow2.f32 %v239_v10 }
  0xb2   : > { %422 = vpow2.f32 %v235_v19 }
  0xb4   : > { %v247_v13 = vpop.permute.xlu0 %246 }
  0xb5   : > { %vm248_vm1 = vcmp.eq.s32.totalorder %v212_v12, %v247_v13 }
  0xb6   : > { %v249_v15 = vsel %vm248_vm1, %v229_v5, 0.0 }
  0xb7   : > { %v250_v17 = vsel %vm230_vm0, %v249_v15, 0.0 }
  0xbb   : > { %v421_v14 = vpop.eup %420 }
  0xbc   : > { %v241_v16 = vsel %vm230_vm0, %v421_v14, 0.0  ;;  %v423_v20 = vpop.eup %422 }
  0xbd   : > { %242 = vadd.xlane.f32.xlu1 %v241_v16  ;;  %v237_v21 = vmul.f32 0.0, %v423_v20 }
  0xc1   : > { %251 = vadd.xlane.f32.xlu1 %v250_v17 }
 0x14a   : > { %v243_v22 = vpop.xlane.xlu1 %242 }
 0x14b   : > { %v244_v23 = vadd.f32 %v243_v22, %v237_v21 }
 0x14d   : > { %424 = vlog2.f32 %v244_v23 }
 0x14e   : > { %v252_v29 = vpop.xlane.xlu1 %251 }
 0x157   : > { %v425_v26 = vpop.eup %424 }
 0x158   : > { %v255_v28 = vmul.f32 0.6931472, %v425_v26 }
 0x15a   : > { %v256_v30 = vadd.f32 %v255_v28, %v233_v8 }
 0x15c   : > { %v257_v31 = vsub.f32 %v256_v30, %v252_v29 }
 0x15e   : > { %v264_v32 = vsel %vm263_vm2, %v257_v31, 0.0 }
 0x15f   : > { %v266_v33 = vsel %vm265_vm3, %v264_v32, 0.0 }
 0x160   : > { %267 = vadd.xlane.f32.xlu1 %v266_v33 }
 0x1ed   : > { %v268_v34 = vpop.xlane.xlu1 %267 }
 0x1ee   : > { %v269_v35 = vrot.slane %v268_v34, 4 }
 0x1f0   : > { %v270_v36 = vadd.f32 %v269_v35, %v268_v34 }
 0x1f2   : > { %v271_v37 = vrot.slane %v270_v36, 2 }
 0x1f4   : > { %v272_v38 = vadd.f32 %v271_v37, %v270_v36 }
 0x1f6   : > { %v273_v39 = vrot.slane %v272_v38, 1 }
 0x1f8   : > { %v274_v40 = vadd.f32 %v273_v39, %v272_v38 }
 0x1fa   : > { %377 = vpush %v274_v40 }
 0x22b   : > { %s378_s28 = spop %377 }
 0x22c   : > { %v276_v41 = vstv %s378_s28 }
 0x22d   : > { %277 = vst [vmem:[%s201_s22] sm:$0xff] %v276_v41 }
 0x22e   : > { %439 = shalt.err (!%p436_p3)
}
 0x22f   : > { %s440_s10 = scalar_lea.hbm %s590_s5, 128  ;;  %s444_s13 = scalar_lea.hbm %s634_s4, 384 }
 0x230   : > { %p441_p4 = scmp.ne.s32.totalorder %s590_s5, %s440_s10  ;;  %p445_p9 = scmp.lt.u32.totalorder %s590_s5, %s634_s4 }
 0x231   : > { %p446_p10 = scmp.lt.u32.totalorder %s444_s13, %s440_s10  ;;  %p448_p12 = scmp.lt.u32.totalorder %s440_s10, %s590_s5 }
 0x232   : > { %p442_p7 = pnand %p441_p4, %p555_p5 }
 0x233   : > { %p447_p11 = por %p446_p10, %p445_p9 }
 0x234   : > { %p443_p8 = pneg %p442_p7 }
 0x235   : > { %p449_p13 = por %p448_p12, %p447_p11 }
 0x237   : > { %p450_p0 = pnand %p449_p13, %p443_p8 }
 0x239   : > { %453 = shalt.err (!%p450_p0)
}
 0x23a   : > { %379 = dma.vmem_to_hbm [thread:$0]  (%p555_p5), %s585_s23, 128, %s590_s5, %s279_s6  }
 0x23b PF: > { %p385_p1 = scmp.ge.s32.totalorder %s488_s18, 2  ;;  %s304_s22 = sand.u32 1, %s476_s15  }
 0x23c   : > { %s305_s27 = scalar_lea.sflag [#allocation3], %s304_s22 }
 0x23d   : > { %p382_p2 = pnand %p385_p1, %p559_p6 }
 0x23f   : > { %471 = dma.done.wait (!%p382_p2), %s305_s27, 128  }
 0x240   : > { %473 = vsyncadd (!%p382_p2), %s305_s27, 4294967168  ;;  %p14_p3 = scmp.ge.s32.totalorder %s542_s21, 5   ;;  %s637_s15 = smov %s480_s16 }
 0x241   : > { %s638_s16 = smov %s484_s17  ;;  %s639_s17 = smov %s553_s24 }
 0x242   : > { %s640_s18 = smov %s542_s21  ;;  %16 = sbr.rel (!%p14_p3) target bundleno = 3 (0x3), region = 74 }
 0x249   :  { %310 = vsyncpa [#allocation3], 1 }
 0x24a   :  { %312 = vsyncpa [#allocation3 + $0x1], 1 }

</bundles_post_ra>
